<compile_context>
chip_gen: v6e
topology: v6e:2x2x1
jax: 0.10.0
libtpu: 0.0.40
codegen_flags: <defaults>
</compile_context>

<pallas_src>
import functools

import jax
import jax.numpy as jnp
from jax import lax
from jax.experimental import pallas as pl
from jax.experimental.pallas import tpu as pltpu


def _mlp_kernel(x_ref, w1_ref, b1_ref, w2_ref, b2_ref, o_ref, *, use_sigmoid):
    # x:  [TB, F] f32 (cast to bf16 in-kernel)
    # w1: [H, F]  bf16 (PyTorch [out, in])      b1: [H, 1] f32
    # w2: [O, H]  bf16                          b2: [O, 1] f32
    # o:  [O, TB] f32  (lane-dense over the batch axis)
    x_bf = x_ref[...].astype(jnp.bfloat16)

    # h^T = w1 @ x^T without emitting a transpose: contract w1 dim 1 (F) with
    # x dim 1 (F) -> [H, TB].
    h = lax.dot_general(
        w1_ref[...], x_bf,
        dimension_numbers=(((1,), (1,)), ((), ())),
        preferred_element_type=jnp.float32,
    )
    h = jnp.maximum(h + b1_ref[...], 0.0)            # bias + ReLU, f32 (v5e-safe)

    # logits^T = w2 @ h -> [O, TB]
    logits = lax.dot_general(
        w2_ref[...], h.astype(jnp.bfloat16),
        dimension_numbers=(((1,), (0,)), ((), ())),
        preferred_element_type=jnp.float32,
    )
    logits = logits + b2_ref[...]

    # NOTE: for a ragged last batch tile the out-of-bounds columns hold garbage
    # (exp may produce inf there); those columns are never stored (Pallas masks
    # the partial output block), so this is intentionally left as-is.
    if use_sigmoid:
        o_ref[...] = (1.0 / (1.0 + jnp.exp(-logits))).astype(o_ref.dtype)
    else:
        # Numerically stable softmax over the output-feature axis (axis 0 here).
        m = jnp.max(logits, axis=0, keepdims=True)
        e = jnp.exp(logits - m)
        denom = jnp.sum(e, axis=0, keepdims=True)
        o_ref[...] = (e / denom).astype(o_ref.dtype)


def prepare_params(w_hidden, b_hidden, w_out, b_out):
    """One-time parameter prep (casts/reshapes hoisted out of the call path).

    Weights stay in PyTorch [out, in] layout (no transposes); biases become
    column vectors so they broadcast against the transposed activations.
    """
    H = w_hidden.shape[0]
    O = w_out.shape[0]
    return (
        w_hidden.astype(jnp.bfloat16),                 # [H, F]
        b_hidden.reshape(H, 1).astype(jnp.float32),    # [H, 1]
        w_out.astype(jnp.bfloat16),                    # [O, H]
        b_out.reshape(O, 1).astype(jnp.float32),       # [O, 1]
    )


def net_forward(x, params, *, tile_b=2048):
    """x: [B, n_feature] f32; params = prepare_params(...). Returns [B, n_output] f32."""
    w1, b1, w2, b2 = params
    B, F = x.shape
    H = w1.shape[0]
    O = w2.shape[0]
    use_sigmoid = (O == 1)

    # Batch tiling (batch rides the 128-lane axis of the output).
    #  * big B: stream tile_b-row tiles; ragged last tile is masked by Pallas.
    #  * mid B: split into 2 tiles so v7x's 2 TensorCores both get work.
    #  * tiny B: single full-batch tile.
    if B > tile_b:
        tb = tile_b                                    # multiple of 8 and 128
    elif B >= 16 and B % 16 == 0:
        tb = B // 2                                    # >=2 grid steps for v7x
    else:
        tb = B
    grid = (pl.cdiv(B, tb),)

    cost = pl.CostEstimate(
        flops=2 * B * (F * H + H * O),
        transcendentals=B * (O + 1),
        bytes_accessed=(B * F * 4 + H * F * 2 + O * H * 2
                        + H * 4 + O * 4 + B * O * 4),
    )

    kernel = functools.partial(_mlp_kernel, use_sigmoid=use_sigmoid)
    out_t = pl.pallas_call(
        kernel,
        out_shape=jax.ShapeDtypeStruct((O, B), jnp.float32),   # transposed, lane-dense
        grid=grid,
        in_specs=[
            pl.BlockSpec((tb, F), lambda i: (i, 0)),   # x: streamed per grid step
            pl.BlockSpec((H, F), lambda i: (0, 0)),    # w1: resident in VMEM
            pl.BlockSpec((H, 1), lambda i: (0, 0)),    # b1: resident
            pl.BlockSpec((O, H), lambda i: (0, 0)),    # w2: resident
            pl.BlockSpec((O, 1), lambda i: (0, 0)),    # b2: resident
        ],
        out_specs=pl.BlockSpec((O, tb), lambda i: (0, i)),
        compiler_params=pltpu.CompilerParams(
            dimension_semantics=("parallel",),         # v7x: shard batch across 2 TCs
        ),
        cost_estimate=cost,
    )(x, w1, b1, w2, b2)

    # Tiny [O, B] -> [B, O] transpose (B*O f32) to match the module's output layout.
    return out_t.T


def _reference(x, w_hidden, b_hidden, w_out, b_out):
    """Plain-JAX reference with the same bf16-operand / f32-accumulate matmuls."""
    O = w_out.shape[0]
    h = jnp.dot(x.astype(jnp.bfloat16), w_hidden.T.astype(jnp.bfloat16),
                preferred_element_type=jnp.float32) + b_hidden
    h = jnp.maximum(h, 0.0)
    logits = jnp.dot(h.astype(jnp.bfloat16), w_out.T.astype(jnp.bfloat16),
                     preferred_element_type=jnp.float32) + b_out
    return jax.nn.sigmoid(logits) if O == 1 else jax.nn.softmax(logits, axis=-1)


if __name__ == "__main__":
    # Small shapes consistent with the module: Net(n_feature=32, n_hidden=64, n_output=4)
    B, n_feature, n_hidden, n_output = 8, 32, 64, 4

    key = jax.random.PRNGKey(0)
    kx, kw1, kb1, kw2, kb2, kw3, kb3 = jax.random.split(key, 7)

    x = jax.random.normal(kx, (B, n_feature), dtype=jnp.float32)

    # Deterministic synthetic params, PyTorch Linear-style uniform(-1/sqrt(fan_in), +)
    bound1 = 1.0 / (n_feature ** 0.5)
    w_hidden = jax.random.uniform(kw1, (n_hidden, n_feature), jnp.float32, -bound1, bound1)
    b_hidden = jax.random.uniform(kb1, (n_hidden,), jnp.float32, -bound1, bound1)
    bound2 = 1.0 / (n_hidden ** 0.5)
    w_out = jax.random.uniform(kw2, (n_output, n_hidden), jnp.float32, -bound2, bound2)
    b_out = jax.random.uniform(kb2, (n_output,), jnp.float32, -bound2, bound2)

    # --- softmax branch (n_output > 1) ---
    params = prepare_params(w_hidden, b_hidden, w_out, b_out)   # one-time prep
    out = jax.block_until_ready(net_forward(x, params))
    ref = _reference(x, w_hidden, b_hidden, w_out, b_out)
    assert out.shape == (B, n_output)
    assert jnp.allclose(out, ref, atol=2e-3, rtol=2e-3), "softmax branch mismatch vs reference"

    # --- sigmoid branch (n_output == 1) ---
    w_out1 = jax.random.uniform(kw3, (1, n_hidden), jnp.float32, -bound2, bound2)
    b_out1 = jax.random.uniform(kb3, (1,), jnp.float32, -bound2, bound2)
    params1 = prepare_params(w_hidden, b_hidden, w_out1, b_out1)
    out1 = jax.block_until_ready(net_forward(x, params1))
    ref1 = _reference(x, w_hidden, b_hidden, w_out1, b_out1)
    assert out1.shape == (B, 1)
    assert jnp.allclose(out1, ref1, atol=2e-3, rtol=2e-3), "sigmoid branch mismatch vs reference"

    print("KERNEL_OK")
</pallas_src>

<mosaic_0001>
module attributes {stable_mosaic.version = 11 : i64} {
  func.func @_mlp_kernel(%arg0: i32, %arg1: memref<8x32xf32, #tpu.memory_space<vmem>>, %arg2: memref<64x32xbf16, #tpu.memory_space<vmem>>, %arg3: memref<64x1xf32, #tpu.memory_space<vmem>>, %arg4: memref<4x64xbf16, #tpu.memory_space<vmem>>, %arg5: memref<4x1xf32, #tpu.memory_space<vmem>>, %arg6: memref<4x8xf32, #tpu.memory_space<vmem>>) attributes {dimension_semantics = [#tpu.dimension_semantics<parallel>], iteration_bounds = array<i64: 1>, scalar_prefetch = 0 : i64, scratch_operands = 0 : i64, tpu.core_type = #tpu.core_type<tc>, window_params = [{transform_indices = @transform_0, window_bounds = array<i64: 8, 32>}, {pipeline_mode = #tpu.pipeline_mode<synchronous>, transform_indices = @transform_1, window_bounds = array<i64: 64, 32>}, {pipeline_mode = #tpu.pipeline_mode<synchronous>, transform_indices = @transform_2, window_bounds = array<i64: 64, 1>}, {pipeline_mode = #tpu.pipeline_mode<synchronous>, transform_indices = @transform_3, window_bounds = array<i64: 4, 64>}, {pipeline_mode = #tpu.pipeline_mode<synchronous>, transform_indices = @transform_4, window_bounds = array<i64: 4, 1>}, {transform_indices = @transform_5, window_bounds = array<i64: 4, 8>}]} {
    %c0 = arith.constant 0 : index
    %c0_0 = arith.constant 0 : index
    %0 = vector.load %arg1[%c0, %c0_0] : memref<8x32xf32, #tpu.memory_space<vmem>>, vector<8x32xf32>
    %1 = arith.truncf %0 : vector<8x32xf32> to vector<8x32xbf16>
    %c0_1 = arith.constant 0 : index
    %c0_2 = arith.constant 0 : index
    %2 = vector.load %arg2[%c0_1, %c0_2] : memref<64x32xbf16, #tpu.memory_space<vmem>>, vector<64x32xbf16>
    %cst = arith.constant dense<0.000000e+00> : vector<64x8xf32>
    %3 = tpu.matmul %2, %1, %cst {dimension_numbers = #tpu.dot_dimension_numbers<[1], [1], [0], [0], [0, 0, 1, 0], [], []>} : vector<64x32xbf16>, vector<8x32xbf16>, vector<64x8xf32> -> vector<64x8xf32>
    %c0_3 = arith.constant 0 : index
    %c0_4 = arith.constant 0 : index
    %4 = vector.load %arg3[%c0_3, %c0_4] : memref<64x1xf32, #tpu.memory_space<vmem>>, vector<64x1xf32>
    %5 = vector.broadcast %4 : vector<64x1xf32> to vector<64x8xf32>
    %6 = arith.addf %3, %5 : vector<64x8xf32>
    %cst_5 = arith.constant 0.000000e+00 : f32
    %7 = vector.broadcast %cst_5 : f32 to vector<64x8xf32>
    %8 = arith.maximumf %6, %7 : vector<64x8xf32>
    %c0_6 = arith.constant 0 : index
    %c0_7 = arith.constant 0 : index
    %9 = vector.load %arg4[%c0_6, %c0_7] : memref<4x64xbf16, #tpu.memory_space<vmem>>, vector<4x64xbf16>
    %10 = arith.truncf %8 : vector<64x8xf32> to vector<64x8xbf16>
    %cst_8 = arith.constant dense<0.000000e+00> : vector<4x8xf32>
    %11 = tpu.matmul %9, %10, %cst_8 {dimension_numbers = #tpu.dot_dimension_numbers<[1], [0], [0], [1], [0, 0, 1, 1], [], []>} : vector<4x64xbf16>, vector<64x8xbf16>, vector<4x8xf32> -> vector<4x8xf32>
    %c0_9 = arith.constant 0 : index
    %c0_10 = arith.constant 0 : index
    %12 = vector.load %arg5[%c0_9, %c0_10] : memref<4x1xf32, #tpu.memory_space<vmem>>, vector<4x1xf32>
    %13 = vector.broadcast %12 : vector<4x1xf32> to vector<4x8xf32>
    %14 = arith.addf %11, %13 : vector<4x8xf32>
    %cst_11 = arith.constant dense<0xFF800000> : vector<8xf32>
    %15 = vector.multi_reduction <maximumf>, %14, %cst_11 [0] : vector<4x8xf32> to vector<8xf32>
    %16 = vector.shape_cast %15 : vector<8xf32> to vector<1x8xf32>
    %17 = vector.broadcast %16 : vector<1x8xf32> to vector<4x8xf32>
    %18 = arith.subf %14, %17 : vector<4x8xf32>
    %19 = math.exp %18 : vector<4x8xf32>
    %cst_12 = arith.constant dense<0.000000e+00> : vector<8xf32>
    %20 = vector.multi_reduction <add>, %19, %cst_12 [0] : vector<4x8xf32> to vector<8xf32>
    %21 = vector.shape_cast %20 : vector<8xf32> to vector<1x8xf32>
    %22 = vector.broadcast %21 : vector<1x8xf32> to vector<4x8xf32>
    %23 = arith.divf %19, %22 : vector<4x8xf32>
    %c0_13 = arith.constant 0 : index
    %c0_14 = arith.constant 0 : index
    %24 = vector.load %arg6[%c0_13, %c0_14] : memref<4x8xf32, #tpu.memory_space<vmem>>, vector<4x8xf32>
    tpu.vector_store %arg6[%c0_13, %c0_14], %23 {strides = array<i32>} : memref<4x8xf32, #tpu.memory_space<vmem>>, vector<4x8xf32>,
    return
  }
  func.func @transform_0(%arg0: i32) -> (i32, i32) {
    %c0_i32 = arith.constant 0 : i32
    %c0_i32_0 = arith.constant 0 : i32
    return %arg0, %c0_i32 : i32, i32
  }
  func.func @transform_1(%arg0: i32) -> (i32, i32) {
    %c0_i32 = arith.constant 0 : i32
    %c0_i32_0 = arith.constant 0 : i32
    %c0_i32_1 = arith.constant 0 : i32
    return %c0_i32, %c0_i32_0 : i32, i32
  }
  func.func @transform_2(%arg0: i32) -> (i32, i32) {
    %c0_i32 = arith.constant 0 : i32
    %c0_i32_0 = arith.constant 0 : i32
    %c0_i32_1 = arith.constant 0 : i32
    return %c0_i32, %c0_i32_0 : i32, i32
  }
  func.func @transform_3(%arg0: i32) -> (i32, i32) {
    %c0_i32 = arith.constant 0 : i32
    %c0_i32_0 = arith.constant 0 : i32
    %c0_i32_1 = arith.constant 0 : i32
    return %c0_i32, %c0_i32_0 : i32, i32
  }
  func.func @transform_4(%arg0: i32) -> (i32, i32) {
    %c0_i32 = arith.constant 0 : i32
    %c0_i32_0 = arith.constant 0 : i32
    %c0_i32_1 = arith.constant 0 : i32
    return %c0_i32, %c0_i32_0 : i32, i32
  }
  func.func @transform_5(%arg0: i32) -> (i32, i32) {
    %c0_i32 = arith.constant 0 : i32
    %c0_i32_0 = arith.constant 0 : i32
    return %c0_i32, %arg0 : i32, i32
  }
}

</mosaic_0001>

<bundles_post_ra>
// kernel: tpu_custom_call.1
= control target key start
LH: loop header
LB: loop body
LE: loop exit
PB: predicated region body
PF: predicated region fallthrough
CT: control target
= control target key end

     0   :  { %vm100_vm0 = vcmask 261120   ;;  %v357_v3 = vmov 0   ;;  %s448_s0 = inlined_call_operand.vmem [shape: f32[8,32], index: 0, kind: input, shape index: {}]   ;;  %s449_s1 = inlined_call_operand.vmem [shape: bf16[64,32], index: 1, kind: input, shape index: {}]   ;;  %s450_s2 = inlined_call_operand.vmem [shape: f32[64,1], index: 2, kind: input, shape index: {}]   ;;  %s451_s3 = inlined_call_operand.vmem [shape: bf16[4,64], index: 3, kind: input, shape index: {}]   ;;  %s452_s4 = inlined_call_operand.vmem [shape: f32[4,1], index: 4, kind: input, shape index: {}]   ;;  %s453_s5 = inlined_call_operand.hbm [shape: f32[4,8], index: 5, kind: output, shape index: {}]  }
   0x1   :  { %v22_v0 = vld [vmem:[%s448_s0] sm:$0xff]  ;;  %325 = vset.pattern.permute.xlu0 %v357_v3  ;;  %326 = vset.pattern.permute.xlu1 %v357_v3  ;;  %v38_v5 = vld [vmem:[%s450_s2 + $0x30] sm:$0xff]  ;;  %v39_v7 = vld [vmem:[%s450_s2 + $0x38] sm:$0xff] }
   0x2   :  { %v23_v1 = vpack.c.bf16 %v22_v0, %v22_v0  ;;  %v327_v2 = vld [vmem:[%s449_s1] sm:$0xff]   ;;  %72 = vperm.xlu0 %325, %v38_v5   ;;  %v328_v8 = vld [vmem:[%s449_s1 + $0x8] sm:$0xff]  }
   0x3   :  { %300 = vmatprep.mubr.msk.bf16.mxu0 %vm100_vm0, %v327_v2  ;;  %v36_v6 = vld [vmem:[%s450_s2 + $0x20] sm:$0xff]  ;;  %v37_v9 = vld [vmem:[%s450_s2 + $0x28] sm:$0xff] }
   0x4   :  { %320 = vmatprep.subr.msk.bf16.mxu0 %vm100_vm0, %v23_v1  ;;  %v114_v4 = vsel %vm100_vm0, %v23_v1, 0  ;;  %62 = vperm.xlu1 %326, %v36_v6  }
   0x5   :  { %299 = vmatpush3.bf16.xpose.msra.mxu0 %v114_v4 }
   0x6   :  { %10 = vsyncpa [#allocation3], 0  ;;  %v329_v10 = vld [vmem:[%s449_s1 + $0x10] sm:$0xff]   ;;  %77 = vperm.xlu0 %325, %v39_v7   ;;  %v35_v12 = vld [vmem:[%s450_s2 + $0x18] sm:$0xff]  ;;  %v358_v17 = vmov 0.0   ;;  %vm359_vm1 = vmmov 0  }
   0x7   :  { %v34_v11 = vld [vmem:[%s450_s2 + $0x10] sm:$0xff]  ;;  %v32_v13 = vld [vmem:[%s450_s2] sm:$0xff]  ;;  %v330_v14 = vld [vmem:[%s449_s1 + $0x18] sm:$0xff]   ;;  %308 = vmatprep.subr.bf16.mxu1 %v358_v17  ;;  %316 = vmatprep.mubr.msk.bf16.mxu1 %vm359_vm1, %v358_v17  ;;  %vm200_vm2 = vcmask 523264   ;;  %vm244_vm3 = vcmask 60416  }
   0x8   :  { %67 = vperm.xlu1 %326, %v37_v9   ;;  %v33_v15 = vld [vmem:[%s450_s2 + $0x8] sm:$0xff]  ;;  %v194_v16 = vld [vmem:[%s452_s4] sm:$0xf] }
   0x9   :  { %v189_v54 = vld [vmem:[%s451_s3] sm:$0x3]  ;;  %s360_s3 = smov [#allocation2]  }
   0xa   :  { %52 = vperm.xlu0 %325, %v34_v11   ;;  %s271_s4 = sshll.u32 %s360_s3, 4  ;;  %s272_s4 = int_to_ptr.vmem [resolvable:$true] %s271_s4 }
   0xb   :  { %s335_s20 = scalar_lea.vmem %s272_s4, 64  ;;  %p340_p1 = scmp.lt.s32.totalorder %s272_s4, %s272_s4 }
   0xc   :  { %301 = vmatmul.mubr.msk.bf16.vlgmr.msra.gmra.mxu0 %vm100_vm0, %v328_v8  ;;  %57 = vperm.xlu1 %326, %v35_v12   ;;  %p336_p0 = scmp.ne.s32.totalorder %s272_s4, %s335_s20  ;;  %p341_p2 = scmp.lt.s32.totalorder %s335_s20, %s335_s20 }
   0xd   :  { %304 = vmatprep.mubr.msk.bf16.mxu0 %vm100_vm0, %v329_v10 }
   0xe   :  { %42 = vperm.xlu0 %325, %v32_v13   ;;  %p342_p3 = por %p341_p2, %p340_p1 }
  0x10   :  { %47 = vperm.xlu1 %326, %v33_v15   ;;  %p343_p4 = pnand %p342_p3, %p336_p0 }
  0x12   :  { %197 = vperm.xlu0 %325, %v194_v16  }
  0x14   :  { %305 = vmatmul.mubr.msk.bf16.gmra.mxu0 %vm100_vm0, %v330_v14 }
  0x7d   :  { %v73_v20 = vpop.permute.xlu0 %72 }
  0x7f   :  { %v63_v18 = vpop.permute.xlu1 %62 }
  0x81   :  { %v78_v25 = vpop.permute.xlu0 %77 }
  0x83   :  { %v68_v23 = vpop.permute.xlu1 %67 }
  0x85   :  { %v53_v32 = vpop.permute.xlu0 %52 }
  0x87   :  { %v58_v29 = vpop.permute.xlu1 %57 }
  0x89   :  { %v43_v44 = vpop.permute.xlu0 %42 }
  0x8b   :  { %v48_v41 = vpop.permute.xlu1 %47 }
  0x8d   :  { %v198_v55 = vpop.permute.xlu0 %197 }
  0xcc   :  { %v302_v19 = vpop.f32.mrf.mxu0 }
  0xcd   :  { %v159_v42 = vadd.f32 %v302_v19, %v53_v32 }
  0xce   :  { %v150_v21 = vpop.f32.mrf.mxu0 }
  0xcf   :  { %v183_v48 = vmax.f32 %v159_v42, 0.0  ;;  %v151_v49 = vadd.f32 %v150_v21, %v43_v44 }
  0xd0   :  { %v303_v22 = vpop.f32.mrf.mxu0 }
  0xd1   :  { %v162_v38 = vadd.f32 %v303_v22, %v58_v29  ;;  %v181_v52 = vmax.f32 %v151_v49, 0.0 }
  0xd2   :  { %v153_v24 = vpop.f32.mrf.mxu0 }
  0xd3   :  { %v184_v45 = vmax.f32 %v162_v38, 0.0  ;;  %v154_v46 = vadd.f32 %v153_v24, %v48_v41 }
  0xd4   :  { %v306_v26 = vpop.f32.mrf.mxu0 }
  0xd5   :  { %v175_v28 = vadd.f32 %v306_v26, %v73_v20  ;;  %v191_v50 = vpack.c.bf16 %v184_v45, %v183_v48  ;;  %v182_v51 = vmax.f32 %v154_v46, 0.0 }
  0xd6   :  { %v166_v27 = vpop.f32.mrf.mxu0 }
  0xd7   :  { %v187_v34 = vmax.f32 %v175_v28, 0.0  ;;  %v167_v35 = vadd.f32 %v166_v27, %v63_v18  ;;  %v190_v53 = vpack.c.bf16 %v182_v51, %v181_v52 }
  0xd8   :  { %v307_v30 = vpop.f32.mrf.mxu0 }
  0xd9   :  { %v178_v31 = vadd.f32 %v307_v30, %v78_v25  ;;  %v185_v43 = vmax.f32 %v167_v35, 0.0 }
  0xda   :  { %v169_v33 = vpop.f32.mrf.mxu0 }
  0xdb   :  { %v188_v36 = vmax.f32 %v178_v31, 0.0  ;;  %v170_v37 = vadd.f32 %v169_v33, %v68_v23 }
  0xdd   :  { %v186_v39 = vmax.f32 %v170_v37, 0.0  ;;  %v193_v40 = vpack.c.bf16 %v188_v36, %v187_v34 }
  0xdf   :  { %309 = vmatpush3.bf16.msra.mxu1 %v193_v40  ;;  %v192_v47 = vpack.c.bf16 %v186_v39, %v185_v43 }
  0xe0   :  { %310 = vmatprep.subr.bf16.mxu1 %v358_v17 }
  0xe3   :  { %311 = vmatpush3.bf16.msra.mxu1 %v192_v47 }
  0xe4   :  { %312 = vmatprep.subr.bf16.mxu1 %v358_v17 }
  0xe7   :  { %313 = vmatpush3.bf16.msra.mxu1 %v191_v50 }
  0xe8   :  { %314 = vmatprep.subr.bf16.mxu1 %v358_v17 }
  0xeb   :  { %315 = vmatpush3.bf16.msra.mxu1 %v190_v53 }
  0xee   :  { %317 = vmatmul.mubr.msk.bf16.vlgmr.msra.gmra.mxu1 %vm200_vm2, %v189_v54 }
 0x1ae   :  { %v238_v56 = vpop.f32.mrf.mxu1 }
 0x1af   :  { %v239_v57 = vadd.f32 %v238_v56, %v198_v55 }
 0x1b0   :  { %v318_v58 = vpop.f32.mrf.mxu1 }
 0x1b1   :  { %v245_v59 = vsel %vm244_vm3, %v239_v57, -inf }
 0x1b2   :  { %v246_v60 = vrot.slane %v245_v59, 4  ;;  %v241_v61 = vpop.f32.mrf.mxu1 }
 0x1b4   :  { %v247_v62 = vmax.f32 %v245_v59, %v246_v60  ;;  %v319_v63 = vpop.f32.mrf.mxu1 }
 0x1b6   :  { %v248_v0 = vrot.slane %v247_v62, 2 }
 0x1b8   :  { %v249_v1 = vmax.f32 %v247_v62, %v248_v0 }
 0x1ba   :  { %v250_v2 = vrot.slane %v249_v1, 1 }
 0x1bc   :  { %v251_v3 = vmax.f32 %v249_v1, %v250_v2 }
 0x1be   :  { %v252_v4 = vsub.f32 %v239_v57, %v251_v3 }
 0x1c0   :  { %v253_v5 = vmul.f32 1.442695, %v252_v4 }
 0x1c2   :  { %331 = vpow2.f32 %v253_v5 }
 0x1cf   :  { %v332_v6 = vpop.eup %331 }
 0x1d0   :  { %v255_v7 = vsel %vm244_vm3, %v332_v6, 0.0 }
 0x1d1   :  { %v256_v8 = vrot.slane %v255_v7, 4 }
 0x1d3   :  { %v257_v9 = vadd.f32 %v256_v8, %v255_v7 }
 0x1d5   :  { %v258_v10 = vrot.slane %v257_v9, 2 }
 0x1d7   :  { %v259_v11 = vadd.f32 %v258_v10, %v257_v9 }
 0x1d9   :  { %v260_v12 = vrot.slane %v259_v11, 1 }
 0x1db   :  { %v261_v13 = vadd.f32 %v260_v12, %v259_v11 }
 0x1dd   :  { %333 = vrcp.f32 %v261_v13 }
 0x1ea   :  { %v334_v14 = vpop.eup %333 }
 0x1eb   :  { %v263_v15 = vmul.f32 %v334_v14, %v332_v6 }
 0x1ed   :  { %264 = vst.msk [vmem:[#allocation2] sm:$0xf] %vm244_vm3, %v263_v15 }
 0x1ee   :  { %346 = shalt.err (!%p343_p4)
}
 0x1ef   :  { %274 = dma.vmem_to_hbm [thread:$0]  %s272_s4, 64, %s453_s5, [#allocation3]  }
 0x1f0   :  { %355 = dma.done.wait [#allocation3], 64  }
 0x1f1   :  { %356 = vsyncadd [#allocation3], 4294967232 }
 0x1f2   :  { %278 = vsyncpa [#allocation3], 1 }

</bundles_post_ra>
